<compile_context>
chip_gen: v7x
topology: tpu7x:2x2x1
jax: 0.10.0
libtpu: 0.0.40
codegen_flags: <defaults>
</compile_context>

<pallas_src>
import math
import functools

import jax
import jax.numpy as jnp
from jax.experimental import pallas as pl
from jax.experimental.pallas import tpu as pltpu


def _round_up(x: int, m: int) -> int:
    return ((x + m - 1) // m) * m


def framework_kernel(
    gfeat_ref,    # [TG, Db]   graph-feature row tile            (mxu dtype)
    mask_ref,     # [TG, Nsp]  int8, 1 => masked out (Attn_mask)
    a_ref,        # [Db, Nsp]  A = (WQ^T/sqrt(M)) @ K^T           (mxu dtype)
    c_ref,        # [1,  Nsp]  c = (bq/sqrt(M)) @ K^T             (f32)
    v1_ref,       # [Nsp, Ds]  V1 = sub_feat @ W1^T               (mxu dtype)
    b1_ref,       # [1,  Ds]   predictor layer-1 bias             (f32)
    w2_ref,       # [Ds, TP]   predictor layer-2 weight, lane-pad (mxu dtype)
    b2_ref,       # [1,  TP]   lane-padded bias                   (f32)
    out_ref,      # [TG, TP]   lane-dense output tile             (f32)
):
    # --- AttentionAgger: Q projection + Q K^T folded into one matmul -------
    logits = jnp.dot(gfeat_ref[...], a_ref[...],
                     preferred_element_type=jnp.float32) + c_ref[...]

    # masked_fill(Attn, mask, -(1 << 32))  (value exactly representable in f32)
    neg_big = jnp.float32(-(1 << 32))
    logits = jnp.where(mask_ref[...] != 0, neg_big, logits)

    # softmax over last dim (numerically stabilized, f32 VPU/EUP math)
    m = jnp.max(logits, axis=-1, keepdims=True)
    e = jnp.exp(logits - m)
    d = jnp.sum(e, axis=-1, keepdims=True)
    attn = e * pl.reciprocal(d, approx=True)          # EUP vrcp

    # --- predictor:  (Attn @ V) @ W1^T == Attn @ (V @ W1^T) = Attn @ V1 ----
    h = jnp.dot(attn.astype(v1_ref.dtype), v1_ref[...],
                preferred_element_type=jnp.float32) + b1_ref[...]
    h = jnp.maximum(h, 0.0)                            # Dropout(eval) -> ReLU
    out = jnp.dot(h.astype(w2_ref.dtype), w2_ref[...],
                  preferred_element_type=jnp.float32) + b2_ref[...]

    out_ref[...] = out.astype(out_ref.dtype)


def prepare_params(params, lane_pad: int = 128):
    """One-time torch->kernel weight glue (call at model init, not per forward).

    params: torch-style Linear weights:
      wq (M, Db), bq (M,), wk (M, Db), bk (M,),
      w1 (Ds, Ds), b1 (Ds,), w2 (T, Ds), b2 (T,)
    Returns transposed f32 weights with biases as (1, D) rows, 1/sqrt(M)
    folded into WQ/bq, and the final layer padded to TP = round_up(T, 128).
    """
    M, Db = params["wq"].shape
    Ds = params["w1"].shape[1]
    T = params["w2"].shape[0]
    TP = _round_up(T, lane_pad)
    scale = 1.0 / math.sqrt(M)

    wq_t = (params["wq"].T * scale).astype(jnp.float32)            # [Db, M]
    bq = (params["bq"] * scale).reshape(1, M).astype(jnp.float32)  # [1, M]
    wk_t = params["wk"].T.astype(jnp.float32)                      # [Db, M]
    bk = params["bk"].reshape(1, M).astype(jnp.float32)            # [1, M]
    w1_t = params["w1"].T.astype(jnp.float32)                      # [Ds, Ds]
    b1 = params["b1"].reshape(1, Ds).astype(jnp.float32)           # [1, Ds]
    w2_t = jnp.zeros((Ds, TP), jnp.float32).at[:, :T].set(
        params["w2"].T.astype(jnp.float32))                        # [Ds, TP]
    b2 = jnp.zeros((1, TP), jnp.float32).at[:, :T].set(
        params["b2"].astype(jnp.float32))                          # [1, TP]

    return dict(wq_t=wq_t, bq=bq, wk_t=wk_t, bk=bk,
                w1_t=w1_t, b1=b1, w2_t=w2_t, b2=b2)


def _pick_tile(ng: int) -> int:
    """Graph-row tile size. Single tile (no pad) for small batches; 2 tiles
    when big enough and 64-aligned (v7x megacore); TG=256 for big batches."""
    if ng <= 512:
        if ng >= 128 and ng % 64 == 0:
            return ng // 2           # two tiles -> both v7x TensorCores busy
        return ng                    # single full-dim tile, no batch padding
    return 256                       # multiple of 32 (int8-mask friendly)


@functools.partial(jax.jit, static_argnames=("num_tasks", "mxu_dtype"))
def framework_forward(graph_feat, sub_feat, attn_mask, prepped, *,
                      num_tasks, mxu_dtype=jnp.bfloat16):
    """Attention aggregation + predictor as one gridded Pallas kernel.

    graph_feat: [Ng, Db]  (output of base_model)
    sub_feat:   [Ns, Ds]  (output of sub_model)
    attn_mask:  [Ng, Ns]  bool, True => masked OUT (torch Attn_mask)
    """
    Ng, Db = graph_feat.shape
    Ns, Ds = sub_feat.shape
    assert Db == Ds, "AttentionAgger requires base_dim == sub_dim (WK uses Qdim)"
    TP = prepped["w2_t"].shape[1]

    # ---- lane-dense substructure axis (padded columns are pre-masked) -----
    Nsp = _round_up(Ns, 128)
    sfeat = sub_feat.astype(jnp.float32)
    mask = attn_mask.astype(jnp.int8)
    if Nsp != Ns:
        sfeat = jnp.pad(sfeat, ((0, Nsp - Ns), (0, 0)))
        mask = jnp.pad(mask, ((0, 0), (0, Nsp - Ns)), constant_values=1)

    # ---- grid-invariant per-forward precompute (hoisted out of the kernel) -
    K = sfeat @ prepped["wk_t"] + prepped["bk"]          # [Nsp, M]
    A = prepped["wq_t"] @ K.T                            # [Db, Nsp]  (scaled)
    c = prepped["bq"] @ K.T                              # [1,  Nsp]  (scaled)
    V1 = sfeat @ prepped["w1_t"]                         # [Nsp, Ds]

    # ---- graph-row tiling ---------------------------------------------------
    TG = _pick_tile(Ng)
    Ng_pad = _round_up(Ng, TG)
    gfeat = graph_feat.astype(mxu_dtype)
    if Ng_pad != Ng:
        # padded rows fully masked -> uniform softmax garbage, sliced off below
        gfeat = jnp.pad(gfeat, ((0, Ng_pad - Ng), (0, 0)))
        mask = jnp.pad(mask, ((0, Ng_pad - Ng), (0, 0)), constant_values=1)

    grid = (Ng_pad // TG,)
    tile2 = lambda shape: pl.BlockSpec(shape, lambda i: (i, 0))   # row-tiled
    rep2 = lambda shape: pl.BlockSpec(shape, lambda i: (0, 0))    # replicated

    out_pad = pl.pallas_call(
        framework_kernel,
        out_shape=jax.ShapeDtypeStruct((Ng_pad, TP), jnp.float32),
        grid=grid,
        in_specs=[
            tile2((TG, Db)),                  # graph_feat tile
            tile2((TG, Nsp)),                 # attn_mask tile (int8)
            rep2((Db, Nsp)),                  # A  (Q-proj + QK^T fold)
            rep2((1, Nsp)),                   # c
            rep2((Nsp, Ds)),                  # V1 (V @ W1^T fold)
            rep2((1, Ds)),                    # b1
            rep2((Ds, TP)),                   # W2 (lane-padded)
            rep2((1, TP)),                    # b2
        ],
        out_specs=tile2((TG, TP)),
        compiler_params=pltpu.CompilerParams(
            dimension_semantics=("parallel",),   # megacore on v7x
        ),
    )(
        gfeat, mask,
        A.astype(mxu_dtype), c,
        V1.astype(mxu_dtype), prepped["b1"],
        prepped["w2_t"].astype(mxu_dtype), prepped["b2"],
    )

    return out_pad[:Ng, :num_tasks]


def _torch_linear_init(key, out_dim, in_dim):
    """Deterministic init mimicking torch.nn.Linear (uniform +/- 1/sqrt(fan_in))."""
    kw, kb = jax.random.split(key)
    bound = 1.0 / math.sqrt(in_dim)
    w = jax.random.uniform(kw, (out_dim, in_dim), jnp.float32, -bound, bound)
    b = jax.random.uniform(kb, (out_dim,), jnp.float32, -bound, bound)
    return w, b


def reference_forward(graph_feat, sub_feat, attn_mask, params):
    """Pure-JAX reference matching the PyTorch semantics (eval-mode dropout)."""
    M = params["wq"].shape[0]
    q = graph_feat @ params["wq"].T + params["bq"]
    k = sub_feat @ params["wk"].T + params["bk"]
    attn = (q @ k.T) / math.sqrt(M)
    attn = jnp.where(attn_mask, jnp.float32(-(1 << 32)), attn)
    attn = jax.nn.softmax(attn, axis=-1)
    mol = attn @ sub_feat
    h = jnp.maximum(mol @ params["w1"].T + params["b1"], 0.0)
    return h @ params["w2"].T + params["b2"]


if __name__ == "__main__":
    # Small, module-consistent shapes. base_dim == sub_dim (required by the
    # original AttentionAgger construction), Mdim = max(base_dim, sub_dim).
    N_graphs = 8      # molecules in the batch
    N_subs = 16       # distinct substructures
    base_dim = 32
    sub_dim = 32
    model_dim = max(base_dim, sub_dim)
    num_tasks = 4

    key = jax.random.PRNGKey(0)
    k_g, k_s, k_m, k_wq, k_wk, k_w1, k_w2 = jax.random.split(key, 7)

    # base_model / sub_model are external GNN backbones; their outputs are
    # stand-in features here.
    graph_feat = jax.random.normal(k_g, (N_graphs, base_dim), jnp.float32)
    sub_feat = jax.random.normal(k_s, (N_subs, sub_dim), jnp.float32)

    # keep_mask[i, j] True => molecule i contains substructure j (keep).
    keep_mask = jax.random.bernoulli(k_m, 0.6, (N_graphs, N_subs))
    keep_mask = keep_mask.at[:, 0].set(True)   # >=1 valid substructure per row
    attn_mask = jnp.logical_not(keep_mask)     # True => masked out (Attn_mask)

    wq, bq = _torch_linear_init(k_wq, model_dim, base_dim)
    wk, bk = _torch_linear_init(k_wk, model_dim, base_dim)
    w1, b1 = _torch_linear_init(k_w1, sub_dim, sub_dim)
    w2, b2 = _torch_linear_init(k_w2, num_tasks, sub_dim)

    params = dict(wq=wq, bq=bq, wk=wk, bk=bk, w1=w1, b1=b1, w2=w2, b2=b2)
    prepped = prepare_params(params)            # one-time glue, outside forward

    ref = reference_forward(graph_feat, sub_feat, attn_mask, params)

    # f32 MXU path: only approx-reciprocal + fold reassociation error.
    out_f32 = framework_forward(graph_feat, sub_feat, attn_mask, prepped,
                                num_tasks=num_tasks, mxu_dtype=jnp.float32)
    out_f32 = jax.block_until_ready(out_f32)
    assert out_f32.shape == (N_graphs, num_tasks)
    err_f32 = float(jnp.max(jnp.abs(out_f32 - ref)))
    assert err_f32 < 1e-2, f"f32 mismatch vs reference, max abs err = {err_f32}"

    # bf16 MXU path (default / recommended for v6e & v7x): looser tolerance.
    out_bf16 = framework_forward(graph_feat, sub_feat, attn_mask, prepped,
                                 num_tasks=num_tasks, mxu_dtype=jnp.bfloat16)
    out_bf16 = jax.block_until_ready(out_bf16)
    err_bf16 = float(jnp.max(jnp.abs(out_bf16 - ref)))
    assert err_bf16 < 5e-2, f"bf16 mismatch vs reference, max abs err = {err_bf16}"

    print("KERNEL_OK")
</pallas_src>

<mosaic_0001>
module attributes {stable_mosaic.version = 11 : i64} {
  func.func @framework_kernel(%arg0: i32, %arg1: memref<8x32xf32, #tpu.memory_space<vmem>>, %arg2: memref<8x128xi8, #tpu.memory_space<vmem>>, %arg3: memref<32x128xf32, #tpu.memory_space<vmem>>, %arg4: memref<1x128xf32, #tpu.memory_space<vmem>>, %arg5: memref<128x32xf32, #tpu.memory_space<vmem>>, %arg6: memref<1x32xf32, #tpu.memory_space<vmem>>, %arg7: memref<32x128xf32, #tpu.memory_space<vmem>>, %arg8: memref<1x128xf32, #tpu.memory_space<vmem>>, %arg9: memref<8x128xf32, #tpu.memory_space<vmem>>) attributes {dimension_semantics = [#tpu.dimension_semantics<parallel>], iteration_bounds = array<i64: 1>, scalar_prefetch = 0 : i64, scratch_operands = 0 : i64, tpu.core_type = #tpu.core_type<tc>, window_params = [{transform_indices = @transform_0, window_bounds = array<i64: 8, 32>}, {transform_indices = @transform_1, window_bounds = array<i64: 8, 128>}, {pipeline_mode = #tpu.pipeline_mode<synchronous>, transform_indices = @transform_2, window_bounds = array<i64: 32, 128>}, {pipeline_mode = #tpu.pipeline_mode<synchronous>, transform_indices = @transform_3, window_bounds = array<i64: 1, 128>}, {pipeline_mode = #tpu.pipeline_mode<synchronous>, transform_indices = @transform_4, window_bounds = array<i64: 128, 32>}, {pipeline_mode = #tpu.pipeline_mode<synchronous>, transform_indices = @transform_5, window_bounds = array<i64: 1, 32>}, {pipeline_mode = #tpu.pipeline_mode<synchronous>, transform_indices = @transform_6, window_bounds = array<i64: 32, 128>}, {pipeline_mode = #tpu.pipeline_mode<synchronous>, transform_indices = @transform_7, window_bounds = array<i64: 1, 128>}, {transform_indices = @transform_8, window_bounds = array<i64: 8, 128>}]} {
    %c0 = arith.constant 0 : index
    %c0_0 = arith.constant 0 : index
    %0 = vector.load %arg1[%c0, %c0_0] : memref<8x32xf32, #tpu.memory_space<vmem>>, vector<8x32xf32>
    %c0_1 = arith.constant 0 : index
    %c0_2 = arith.constant 0 : index
    %1 = vector.load %arg3[%c0_1, %c0_2] : memref<32x128xf32, #tpu.memory_space<vmem>>, vector<32x128xf32>
    %cst = arith.constant dense<0.000000e+00> : vector<8x128xf32>
    %2 = tpu.matmul %0, %1, %cst {dimension_numbers = #tpu.dot_dimension_numbers<[1], [0], [0], [1], [0, 0, 1, 1], [], []>} : vector<8x32xf32>, vector<32x128xf32>, vector<8x128xf32> -> vector<8x128xf32>
    %c0_3 = arith.constant 0 : index
    %c0_4 = arith.constant 0 : index
    %3 = vector.load %arg4[%c0_3, %c0_4] : memref<1x128xf32, #tpu.memory_space<vmem>>, vector<1x128xf32>
    %4 = vector.broadcast %3 : vector<1x128xf32> to vector<8x128xf32>
    %5 = arith.addf %2, %4 : vector<8x128xf32>
    %c0_5 = arith.constant 0 : index
    %c0_6 = arith.constant 0 : index
    %6 = vector.load %arg2[%c0_5, %c0_6] : memref<8x128xi8, #tpu.memory_space<vmem>>, vector<8x128xi8>
    %c0_i8 = arith.constant 0 : i8
    %7 = vector.broadcast %c0_i8 : i8 to vector<8x128xi8>
    %8 = arith.cmpi ne, %6, %7 : vector<8x128xi8>
    %cst_7 = arith.constant -4.2949673E+9 : f32
    %9 = vector.broadcast %cst_7 : f32 to vector<8x128xf32>
    %10 = arith.select %8, %9, %5 : vector<8x128xi1>, vector<8x128xf32>
    %cst_8 = arith.constant dense<0xFF800000> : vector<8xf32>
    %11 = vector.multi_reduction <maximumf>, %10, %cst_8 [1] : vector<8x128xf32> to vector<8xf32>
    %12 = vector.shape_cast %11 : vector<8xf32> to vector<8x1xf32>
    %13 = vector.broadcast %12 : vector<8x1xf32> to vector<8x128xf32>
    %14 = arith.subf %10, %13 : vector<8x128xf32>
    %15 = math.exp %14 : vector<8x128xf32>
    %cst_9 = arith.constant dense<0.000000e+00> : vector<8xf32>
    %16 = vector.multi_reduction <add>, %15, %cst_9 [1] : vector<8x128xf32> to vector<8xf32>
    %17 = vector.shape_cast %16 : vector<8xf32> to vector<8x1xf32>
    %18 = tpu.reciprocal %17 {approx = true} : vector<8x1xf32> -> vector<8x1xf32>
    %19 = vector.broadcast %18 : vector<8x1xf32> to vector<8x128xf32>
    %20 = arith.mulf %15, %19 : vector<8x128xf32>
    %c0_10 = arith.constant 0 : index
    %c0_11 = arith.constant 0 : index
    %21 = vector.load %arg5[%c0_10, %c0_11] : memref<128x32xf32, #tpu.memory_space<vmem>>, vector<128x32xf32>
    %cst_12 = arith.constant dense<0.000000e+00> : vector<8x32xf32>
    %22 = tpu.matmul %20, %21, %cst_12 {dimension_numbers = #tpu.dot_dimension_numbers<[1], [0], [0], [1], [0, 0, 1, 1], [], []>} : vector<8x128xf32>, vector<128x32xf32>, vector<8x32xf32> -> vector<8x32xf32>
    %c0_13 = arith.constant 0 : index
    %c0_14 = arith.constant 0 : index
    %23 = vector.load %arg6[%c0_13, %c0_14] : memref<1x32xf32, #tpu.memory_space<vmem>>, vector<1x32xf32>
    %24 = vector.broadcast %23 : vector<1x32xf32> to vector<8x32xf32>
    %25 = arith.addf %22, %24 : vector<8x32xf32>
    %cst_15 = arith.constant 0.000000e+00 : f32
    %26 = vector.broadcast %cst_15 : f32 to vector<8x32xf32>
    %27 = arith.maximumf %25, %26 : vector<8x32xf32>
    %c0_16 = arith.constant 0 : index
    %c0_17 = arith.constant 0 : index
    %28 = vector.load %arg7[%c0_16, %c0_17] : memref<32x128xf32, #tpu.memory_space<vmem>>, vector<32x128xf32>
    %cst_18 = arith.constant dense<0.000000e+00> : vector<8x128xf32>
    %29 = tpu.matmul %27, %28, %cst_18 {dimension_numbers = #tpu.dot_dimension_numbers<[1], [0], [0], [1], [0, 0, 1, 1], [], []>} : vector<8x32xf32>, vector<32x128xf32>, vector<8x128xf32> -> vector<8x128xf32>
    %c0_19 = arith.constant 0 : index
    %c0_20 = arith.constant 0 : index
    %30 = vector.load %arg8[%c0_19, %c0_20] : memref<1x128xf32, #tpu.memory_space<vmem>>, vector<1x128xf32>
    %31 = vector.broadcast %30 : vector<1x128xf32> to vector<8x128xf32>
    %32 = arith.addf %29, %31 : vector<8x128xf32>
    %c0_21 = arith.constant 0 : index
    %c0_22 = arith.constant 0 : index
    %33 = vector.load %arg9[%c0_21, %c0_22] : memref<8x128xf32, #tpu.memory_space<vmem>>, vector<8x128xf32>
    tpu.vector_store %arg9[%c0_21, %c0_22], %32 {strides = array<i32>} : memref<8x128xf32, #tpu.memory_space<vmem>>, vector<8x128xf32>,
    return
  }
  func.func @transform_0(%arg0: i32) -> (i32, i32) {
    %c0_i32 = arith.constant 0 : i32
    %c0_i32_0 = arith.constant 0 : i32
    return %arg0, %c0_i32 : i32, i32
  }
  func.func @transform_1(%arg0: i32) -> (i32, i32) {
    %c0_i32 = arith.constant 0 : i32
    %c0_i32_0 = arith.constant 0 : i32
    return %arg0, %c0_i32 : i32, i32
  }
  func.func @transform_2(%arg0: i32) -> (i32, i32) {
    %c0_i32 = arith.constant 0 : i32
    %c0_i32_0 = arith.constant 0 : i32
    %c0_i32_1 = arith.constant 0 : i32
    return %c0_i32, %c0_i32_0 : i32, i32
  }
  func.func @transform_3(%arg0: i32) -> (i32, i32) {
    %c0_i32 = arith.constant 0 : i32
    %c0_i32_0 = arith.constant 0 : i32
    %c0_i32_1 = arith.constant 0 : i32
    return %c0_i32, %c0_i32_0 : i32, i32
  }
  func.func @transform_4(%arg0: i32) -> (i32, i32) {
    %c0_i32 = arith.constant 0 : i32
    %c0_i32_0 = arith.constant 0 : i32
    %c0_i32_1 = arith.constant 0 : i32
    return %c0_i32, %c0_i32_0 : i32, i32
  }
  func.func @transform_5(%arg0: i32) -> (i32, i32) {
    %c0_i32 = arith.constant 0 : i32
    %c0_i32_0 = arith.constant 0 : i32
    %c0_i32_1 = arith.constant 0 : i32
    return %c0_i32, %c0_i32_0 : i32, i32
  }
  func.func @transform_6(%arg0: i32) -> (i32, i32) {
    %c0_i32 = arith.constant 0 : i32
    %c0_i32_0 = arith.constant 0 : i32
    %c0_i32_1 = arith.constant 0 : i32
    return %c0_i32, %c0_i32_0 : i32, i32
  }
  func.func @transform_7(%arg0: i32) -> (i32, i32) {
    %c0_i32 = arith.constant 0 : i32
    %c0_i32_0 = arith.constant 0 : i32
    %c0_i32_1 = arith.constant 0 : i32
    return %c0_i32, %c0_i32_0 : i32, i32
  }
  func.func @transform_8(%arg0: i32) -> (i32, i32) {
    %c0_i32 = arith.constant 0 : i32
    %c0_i32_0 = arith.constant 0 : i32
    return %arg0, %c0_i32 : i32, i32
  }
}

</mosaic_0001>

<bundles_post_ra>
// kernel: framework_forward.1
= control target key start
LH: loop header
LB: loop body
LE: loop exit
PB: predicated region body
PF: predicated region fallthrough
CT: control target
= control target key end

     0   :  { %v448_v0 = vmov 0.0|0.0   ;;  %vm449_vm0 = vmmov 0   ;;  %v450_v4 = vmov 0.0   ;;  %vm43_vm1 = vcmask 261120   ;;  %s604_s2 = inlined_call_operand.vmem [shape: f32[32,128], index: 2, kind: input, shape index: {}]   ;;  %s605_s0 = inlined_call_operand.vmem [shape: f32[8,32], index: 0, kind: input, shape index: {}]   ;;  %s606_s1 = inlined_call_operand.vmem [shape: s8[8,128], index: 1, kind: input, shape index: {}]   ;;  %s607_s3 = inlined_call_operand.vmem [shape: f32[1,128], index: 3, kind: input, shape index: {}]   ;;  %s608_s4 = inlined_call_operand.vmem [shape: f32[128,32], index: 4, kind: input, shape index: {}]   ;;  %s609_s6 = inlined_call_operand.vmem [shape: f32[32,128], index: 6, kind: input, shape index: {}]   ;;  %s610_s5 = inlined_call_operand.vmem [shape: f32[1,32], index: 5, kind: input, shape index: {}]   ;;  %s611_s7 = inlined_call_operand.vmem [shape: f32[1,128], index: 7, kind: input, shape index: {}]   ;;  %s612_s8 = inlined_call_operand.vmem [shape: f32[8,128], index: 8, kind: output, shape index: {}]  }
   0x1   :  { %404 = vmatprep.subr.bf16.mxu0 %v448_v0  ;;  %v32_v1 = vld [vmem:[%s604_s2] sm:$0xff]  ;;  %v33_v2 = vld [vmem:[%s604_s2 + $0x8] sm:$0xff]  ;;  %v34_v3 = vld [vmem:[%s604_s2 + $0x10] sm:$0xff]  ;;  %355 = vmatprep.mubr.msk.f32.mxu0 %vm449_vm0, %v450_v4  ;;  %v451_v10 = vmov 0  }
   0x2   :  { %v405_v5 = vpack.c.bf16 %v33_v2, %v32_v1  ;;  %v35_v6 = vld [vmem:[%s604_s2 + $0x18] sm:$0xff]  ;;  %410 = vmatprep.subr.bf16.mxu1 %v448_v0  ;;  %390 = vmatprep.mubr.msk.f32.mxu1 %vm449_vm0, %v450_v4  ;;  %v31_v8 = vld [vmem:[%s605_s0] sm:$0xff]  ;;  %v133_v19 = vld [vmem:[%s608_s4 + $0x8] sm:$0xff] }
   0x3   :  { %v408_v7 = vpack.c.bf16 %v35_v6, %v34_v3  ;;  %v117_v9 = vld [vmem:[%s606_s1] sm:$0x3]  ;;  %v134_v20 = vld [vmem:[%s608_s4 + $0x10] sm:$0xff]  ;;  %v135_v22 = vld [vmem:[%s608_s4 + $0x18] sm:$0xff] }
   0x4   :  { %406 = vmatpush3.bf16.msra.mxu0 %v405_v5  ;;  %vm118_vm2 = vnez %v117_v9  ;;  %v315_v13 = vld [vmem:[%s607_s3] ss:$0 sm:$0xff]  ;;  %v414_v23 = vpack.c.bf16 %v135_v22, %v134_v20  ;;  %v137_v25 = vld [vmem:[%s608_s4 + $0x28] sm:$0xff]  ;;  %v138_v27 = vld [vmem:[%s608_s4 + $0x30] sm:$0xff] }
   0x5   :  { %407 = vmatprep.subr.bf16.mxu0 %v448_v0  ;;  %v119_v11 = vsel %vm118_vm2, 16843009, %v451_v10  ;;  %v132_v18 = vld [vmem:[%s608_s4] sm:$0xff]  ;;  %v139_v28 = vld [vmem:[%s608_s4 + $0x38] sm:$0xff]  ;;  %v141_v31 = vld [vmem:[%s608_s4 + $0x48] sm:$0xff] }
   0x6   :  { %v120_v12 = vunpack.c.0.s8 %v119_v11  ;;  %v411_v21 = vpack.c.bf16 %v133_v19, %v132_v18  ;;  %v136_v24 = vld [vmem:[%s608_s4 + $0x20] sm:$0xff]  ;;  %v420_v29 = vpack.c.bf16 %v139_v28, %v138_v27  ;;  %v142_v37 = vld [vmem:[%s608_s4 + $0x50] sm:$0xff]  ;;  %v143_v38 = vld [vmem:[%s608_s4 + $0x58] sm:$0xff] }
   0x7   :  { %v417_v26 = vpack.c.bf16 %v137_v25, %v136_v24  ;;  %v140_v30 = vld [vmem:[%s608_s4 + $0x40] sm:$0xff]  ;;  %v426_v39 = vpack.c.bf16 %v143_v38, %v142_v37  ;;  %v145_v41 = vld [vmem:[%s608_s4 + $0x68] sm:$0xff]  ;;  %v146_v43 = vld [vmem:[%s608_s4 + $0x70] sm:$0xff] }
   0x8   :  { %409 = vmatpush3.bf16.msra.mxu0 %v408_v7  ;;  %vm121_vm3 = vcmp.ne.s32.totalorder %v120_v12, 0  ;;  %412 = vmatpush3.bf16.msra.mxu1 %v411_v21  ;;  %v423_v32 = vpack.c.bf16 %v141_v31, %v140_v30  ;;  %v144_v40 = vld [vmem:[%s608_s4 + $0x60] sm:$0xff]  ;;  %v147_v44 = vld [vmem:[%s608_s4 + $0x78] sm:$0xff]  ;;  %v227_v47 = vld [vmem:[%s609_s6 + $0x8] sm:$0xff] }
   0x9   :  { %434 = vmatprep.subr.bf16.mxu0 %v448_v0  ;;  %413 = vmatprep.subr.bf16.mxu1 %v448_v0  ;;  %v429_v42 = vpack.c.bf16 %v145_v41, %v144_v40  ;;  %v432_v45 = vpack.c.bf16 %v147_v44, %v146_v43  ;;  %v226_v46 = vld [vmem:[%s609_s6] sm:$0xff]  ;;  %v228_v52 = vld [vmem:[%s609_s6 + $0x10] sm:$0xff]  ;;  %v229_v53 = vld [vmem:[%s609_s6 + $0x18] sm:$0xff] }
   0xa   :  { %v435_v48 = vpack.c.bf16 %v227_v47, %v226_v46  ;;  %v438_v54 = vpack.c.bf16 %v229_v53, %v228_v52  ;;  %v317_v55 = vld [vmem:[%s610_s5] ss:$0 sm:$0xff] }
   0xb   :  { %356 = vmatmul.mubr.msk.f32.vlgmr.msra.gmra.mrb[0].mxu0 %vm43_vm1, %v31_v8  ;;  %v318_v60 = vld [vmem:[%s611_s7] ss:$0 sm:$0xff] }
   0xc   :  { %401 = vmatprep.mubr.msk.f32.mxu0 %vm449_vm0, %v450_v4  ;;  %415 = vmatpush3.bf16.msra.mxu1 %v414_v23 }
   0xd   :  { %416 = vmatprep.subr.bf16.mxu1 %v448_v0  ;;  %436 = vmatpush3.bf16.msra.mxu0 %v435_v48 }
   0xe   :  { %437 = vmatprep.subr.bf16.mxu0 %v448_v0 }
  0x10   :  { %418 = vmatpush3.bf16.msra.mxu1 %v417_v26 }
  0x11   :  { %419 = vmatprep.subr.bf16.mxu1 %v448_v0  ;;  %439 = vmatpush3.bf16.msra.mxu0 %v438_v54 }
  0x14   :  { %421 = vmatpush3.bf16.msra.mxu1 %v420_v29 }
  0x15   :  { %422 = vmatprep.subr.bf16.mxu1 %v448_v0 }
  0x18   :  { %424 = vmatpush3.bf16.msra.mxu1 %v423_v32 }
  0x19   :  { %425 = vmatprep.subr.bf16.mxu1 %v448_v0 }
  0x1c   :  { %427 = vmatpush3.bf16.msra.mxu1 %v426_v39 }
  0x1d   :  { %428 = vmatprep.subr.bf16.mxu1 %v448_v0 }
  0x20   :  { %430 = vmatpush3.bf16.msra.mxu1 %v429_v42 }
  0x21   :  { %431 = vmatprep.subr.bf16.mxu1 %v448_v0 }
  0x24   :  { %433 = vmatpush3.bf16.msra.mxu1 %v432_v45 }
  0xde   :  { %v113_v14 = vpop.f32.mrb[0].mxu0 }
  0xdf   :  { %v114_v15 = vadd.f32 %v315_v13, %v113_v14  ;;  %v357_v16 = vpop.f32.mrb[1].mxu0 }
  0xe1   :  { %v122_v17 = vsel %vm121_vm3, -4.2949673e+09, %v114_v15 }
  0xe2   :  { %123 = vmax.xlane.f32.xlu0 %v122_v17 }
 0x16f   :  { %v124_v33 = vpop.xlane.xlu0 %123 }
 0x170   :  { %v125_v34 = vsub.f32 %v122_v17, %v124_v33 }
 0x172   :  { %v126_v35 = vmul.f32 1.442695, %v125_v34 }
 0x174   :  { %444 = vpow2.f32 %v126_v35 }
 0x17e   :  { %v445_v36 = vpop.eup %444 }
 0x17f   :  { %128 = vadd.xlane.f32.xlu0 %v445_v36 }
 0x20c   :  { %v129_v49 = vpop.xlane.xlu0 %128 }
 0x20d   :  { %446 = vrcp.f32 %v129_v49 }
 0x217   :  { %v447_v50 = vpop.eup %446 }
 0x218   :  { %v131_v51 = vmul.f32 %v447_v50, %v445_v36 }
 0x21a   :  { %391 = vmatmul.mubr.f32.vlgmr.msra.gmra.mrb[0].mxu1 %v131_v51 }
 0x2ed   :  { %v221_v56 = vpop.f32.mrb[0].mxu1 }
 0x2ee   :  { %v222_v57 = vadd.f32 %v317_v55, %v221_v56  ;;  %v392_v58 = vpop.f32.mrb[1].mxu1 }
 0x2f0   :  { %v225_v59 = vmax.f32 %v222_v57, 0.0 }
 0x2f2   :  { %402 = vmatmul.mubr.msk.f32.vlgmr.msra.gmra.mrb[2].mxu0 %vm43_vm1, %v225_v59 }
 0x3c5   :  { %v306_v61 = vpop.f32.mrb[2].mxu0 }
 0x3c6   :  { %v307_v62 = vadd.f32 %v318_v60, %v306_v61  ;;  %v403_v63 = vpop.f32.mrb[3].mxu0 }
 0x3c8   :  { %310 = vst [vmem:[%s612_s8] sm:$0xff] %v307_v62 }

</bundles_post_ra>
